<compile_context>
chip_gen: v6e
topology: v6e:2x2x1
jax: 0.10.0
libtpu: 0.0.40
codegen_flags: <defaults>
</compile_context>

<pallas_src>
import math
import functools

import jax
import jax.numpy as jnp
from jax.experimental import pallas as pl
from jax.experimental.pallas import tpu as pltpu


def _round_up(x, m):
    return ((x + m - 1) // m) * m


# -----------------------------------------------------------------------------------
# Fast path: token table resident in VMEM (small vocabularies).
# -----------------------------------------------------------------------------------
def _embeddings_vmem_kernel(ids_ref, tok_ref, pos_ref, o_ref, row_buf, *,
                            scale, ts, s_pad):
    # ids_ref : (B*S_pad,) int32 SMEM (scalar prefetch) -- flattened, pre-clamped ids.
    # tok_ref : (V, H) f32 VMEM; constant block index -> DMA'd from HBM exactly once.
    # pos_ref : (ts, H) f32 VMEM tile of positional embeddings (auto-pipelined).
    # o_ref   : (1, ts, H) f32 output tile.
    # row_buf : (ts, H) f32 VMEM scratch for the gathered token rows.
    s = pl.program_id(0)
    b = pl.program_id(1)
    base = b * s_pad + s * ts
    for t in range(ts):                              # static unroll, ts <= 128
        tok_id = ids_ref[base + t]
        row_buf[pl.ds(t, 1), :] = tok_ref[pl.ds(tok_id, 1), :]
    o_ref[0] = (row_buf[...] * scale + pos_ref[...]).astype(o_ref.dtype)


# -----------------------------------------------------------------------------------
# Large-vocab path: table stays in HBM; double-buffered per-row DMA gather.
# -----------------------------------------------------------------------------------
def _embeddings_hbm_kernel(ids_ref, tok_hbm, pos_ref, o_ref, gather_buf, sems, *,
                           scale, ts, s_pad):
    # ids_ref    : (B*S_pad,) int32 SMEM (scalar prefetch).
    # tok_hbm    : (V, H) f32 raw HBM ref (memory_space=pl.ANY) -- never held in VMEM.
    # pos_ref    : (ts, H) f32 VMEM tile (auto-pipelined).
    # o_ref      : (1, ts, H) f32 output tile.
    # gather_buf : (2, ts, H) f32 VMEM -- double-buffered gather destination.
    # sems       : (2,) DMA semaphores -- one shared semaphore per gather slot.
    s = pl.program_id(0)
    b = pl.program_id(1)
    num_b = pl.num_programs(1)
    n_total = pl.num_programs(0) * pl.num_programs(1)
    n = s * num_b + b                 # linear grid step (grid runs sequentially: both
    slot = n % 2                      # axes are "arbitrary", so priming below is valid)

    def issue_gather(step_s, step_b, to_slot):
        base = step_b * s_pad + step_s * ts
        for t in range(ts):           # static unroll; ids pre-clamped -> DMA in-bounds
            tok_id = ids_ref[base + t]
            pltpu.make_async_copy(
                tok_hbm.at[pl.ds(tok_id, 1), :],
                gather_buf.at[to_slot, pl.ds(t, 1), :],
                sems.at[to_slot],
            ).start()

    # Prime the pipeline: the very first grid step gathers its own tile into slot 0.
    @pl.when(n == 0)
    def _():
        issue_gather(s, b, 0)

    # Prefetch the NEXT grid step's rows into the other slot *before* waiting on this
    # one -- the next step's addresses are already known (ids live in SMEM), so its
    # HBM gather overlaps this step's wait/compute/store.
    @pl.when(n + 1 < n_total)
    def _():
        nn = n + 1
        issue_gather(nn // num_b, nn % num_b, 1 - slot)

    # Wait for the current slot's ts row copies.  All copies share one semaphore per
    # slot; each wait retires one row's worth of bytes (shape-matched descriptors).
    for t in range(ts):
        pltpu.make_async_copy(
            tok_hbm.at[pl.ds(0, 1), :],
            gather_buf.at[slot, pl.ds(t, 1), :],
            sems.at[slot],
        ).wait()

    # Fused sqrt(H) scale + positional add; single full-tile store.
    o_ref[0] = (gather_buf[slot] * scale + pos_ref[...]).astype(o_ref.dtype)


# -----------------------------------------------------------------------------------
# Wrapper
# -----------------------------------------------------------------------------------
def _choose_seq_tile(seq_len, hidden_dim, max_tile=128):
    """Sequence tile: multiple of 8 (f32 sublane), <= max_tile, sized for VMEM."""
    if seq_len >= max_tile:
        ts = max_tile
        for cand in range(max_tile, 63, -8):        # prefer a divisor of S (no padding)
            if seq_len % cand == 0:
                ts = cand
                break
    else:
        ts = _round_up(seq_len, 8)
    # Keep ~6 resident (ts, H) f32 tiles (double-buffered pos/out + gather buffers)
    # comfortably inside scoped VMEM on every generation (v5e 16 MiB default, v7x 64 MiB).
    while ts > 8 and 6 * ts * hidden_dim * 4 > (24 << 20):
        ts = max(8, ((ts // 2) // 8) * 8)
    return ts


def _vmem_limit_bytes(resident_table_bytes, tile_bytes):
    need = resident_table_bytes + 6 * tile_bytes
    return int(min(48 << 20, max(32 << 20, need + (8 << 20))))


def embeddings_forward(source, token_table, pos_table, hidden_dim=None, *,
                       force_hbm_gather=False):
    """source: (B, S) int; token_table: (V, H); pos_table: (>=S, H). Returns (B, S, H) f32."""
    B, S = source.shape
    V, H = token_table.shape
    if hidden_dim is not None:
        assert H == hidden_dim
    L = pos_table.shape[0]
    assert L >= S, "sequence length exceeds max_length of the positional table"

    scale = float(math.sqrt(H))
    ts = _choose_seq_tile(S, H)
    S_pad = _round_up(S, ts)
    num_s = S_pad // ts

    # Clamp once in the wrapper (jnp.take semantics; keeps DMAs in-bounds), pad the
    # ragged sequence with a valid id, and flatten to 1-D to keep the SMEM footprint small.
    ids = jnp.clip(source.astype(jnp.int32), 0, V - 1)
    if S_pad != S:
        ids = jnp.pad(ids, ((0, 0), (0, S_pad - S)))
    ids = ids.reshape(-1)                                        # (B * S_pad,)

    tok = token_table if token_table.dtype == jnp.float32 else token_table.astype(jnp.float32)
    pos = pos_table if pos_table.dtype == jnp.float32 else pos_table.astype(jnp.float32)
    if L < S_pad:                         # only when padding pushes past max_length
        pos = jnp.pad(pos, ((0, S_pad - L), (0, 0)))

    tile_bytes = ts * H * 4
    table_bytes = V * H * 4
    use_vmem_table = (not force_hbm_gather) and (2 * table_bytes <= (8 << 20))

    # Positional tile depends only on s (batch is innermost -> not re-DMA'd across b);
    # output tile is lane-dense in H.  NOTE: for real models keep H % 128 == 0 so the
    # output store is an unmasked full-lane vst.
    pos_spec = pl.BlockSpec((ts, H), lambda s, b, ids_smem: (s, 0))
    out_spec = pl.BlockSpec((1, ts, H), lambda s, b, ids_smem: (b, s, 0))

    if use_vmem_table:
        kernel = functools.partial(_embeddings_vmem_kernel, scale=scale, ts=ts, s_pad=S_pad)
        grid_spec = pltpu.PrefetchScalarGridSpec(
            num_scalar_prefetch=1,                     # flat ids land in SMEM
            grid=(num_s, B),                           # sequence leading, batch innermost
            in_specs=[
                pl.BlockSpec((V, H), lambda s, b, ids_smem: (0, 0)),  # table resident in VMEM
                pos_spec,
            ],
            out_specs=out_spec,
            scratch_shapes=[pltpu.VMEM((ts, H), jnp.float32)],
        )
        params = pltpu.CompilerParams(
            dimension_semantics=("parallel", "arbitrary"),
            vmem_limit_bytes=_vmem_limit_bytes(2 * table_bytes, tile_bytes),
        )
    else:
        kernel = functools.partial(_embeddings_hbm_kernel, scale=scale, ts=ts, s_pad=S_pad)
        grid_spec = pltpu.PrefetchScalarGridSpec(
            num_scalar_prefetch=1,
            grid=(num_s, B),
            in_specs=[
                pl.BlockSpec(memory_space=pl.ANY),     # table stays in HBM; rows DMA-gathered
                pos_spec,
            ],
            out_specs=out_spec,
            scratch_shapes=[
                pltpu.VMEM((2, ts, H), jnp.float32),   # double-buffered gather tile
                pltpu.SemaphoreType.DMA((2,)),         # one shared semaphore per slot
            ],
        )
        # Cross-grid-step double buffering carries DMA state between steps, so the grid
        # must run strictly sequentially on one core -> both axes "arbitrary".
        params = pltpu.CompilerParams(
            dimension_semantics=("arbitrary", "arbitrary"),
            vmem_limit_bytes=_vmem_limit_bytes(0, tile_bytes),
        )

    out = pl.pallas_call(
        kernel,
        out_shape=jax.ShapeDtypeStruct((B, S_pad, H), jnp.float32),
        grid_spec=grid_spec,
        compiler_params=params,
    )(ids, tok, pos)

    if S_pad != S:
        out = out[:, :S, :]
    return out


def static_encoding(max_length, hidden_dim):
    """Sinusoidal positional encoding, same as the PyTorch static_encoding()."""
    positions = jnp.arange(max_length, dtype=jnp.float32)[:, None]             # (L, 1)
    div_term = jnp.exp(
        jnp.arange(0, hidden_dim, 2, dtype=jnp.float32)
        * (-(math.log(10000.0) / hidden_dim)))                                 # (H/2,)
    pos_enc = jnp.zeros((max_length, hidden_dim), jnp.float32)
    pos_enc = pos_enc.at[:, 0::2].set(jnp.sin(positions * div_term))
    pos_enc = pos_enc.at[:, 1::2].set(jnp.cos(positions * div_term))
    return pos_enc                                                             # (L, H)


if __name__ == "__main__":
    B, S = 2, 8            # batch, sequence length
    input_dim = 16         # vocabulary size
    hidden_dim = 32
    max_length = 16

    key = jax.random.PRNGKey(0)
    k_ids, k_tok, k_pos = jax.random.split(key, 3)

    source = jax.random.randint(k_ids, (B, S), 0, input_dim, dtype=jnp.int32)
    token_table = jax.random.normal(k_tok, (input_dim, hidden_dim), jnp.float32)
    pos_learned = jax.random.normal(k_pos, (max_length, hidden_dim), jnp.float32)
    pos_static = static_encoding(max_length, hidden_dim)

    def reference(src, tok, pos):
        return (jnp.take(tok, src, axis=0) * math.sqrt(hidden_dim)
                + pos[:src.shape[1]][None, :, :])

    # 1) Default path: small vocab -> VMEM-resident table fast path (learned positions).
    out = jax.block_until_ready(embeddings_forward(source, token_table, pos_learned))
    assert out.shape == (B, S, hidden_dim)
    assert jnp.allclose(out, reference(source, token_table, pos_learned), atol=1e-5, rtol=1e-5)

    # 2) Static sinusoidal positional encoding (same kernel, different table).
    out_static = jax.block_until_ready(embeddings_forward(source, token_table, pos_static))
    assert jnp.allclose(out_static, reference(source, token_table, pos_static),
                        atol=1e-5, rtol=1e-5)

    # 3) Large-vocab code path: HBM table + double-buffered per-row DMA gather.
    out_hbm = jax.block_until_ready(
        embeddings_forward(source, token_table, pos_learned, force_hbm_gather=True))
    assert jnp.allclose(out_hbm, reference(source, token_table, pos_learned),
                        atol=1e-5, rtol=1e-5)

    # 4) Non-multiple-of-8 sequence length exercises the padded-tile path.
    src_odd = source[:, :6]
    out_odd = jax.block_until_ready(embeddings_forward(src_odd, token_table, pos_learned))
    assert out_odd.shape == (B, 6, hidden_dim)
    assert jnp.allclose(out_odd, reference(src_odd, token_table, pos_learned),
                        atol=1e-5, rtol=1e-5)

    print("KERNEL_OK")
</pallas_src>

<mosaic_0001>
module attributes {stable_mosaic.version = 11 : i64} {
  func.func @_embeddings_vmem_kernel(%arg0: i32, %arg1: i32, %arg2: memref<16xi32, #tpu.memory_space<smem>>, %arg3: memref<16x32xf32, #tpu.memory_space<vmem>>, %arg4: memref<8x32xf32, #tpu.memory_space<vmem>>, %arg5: memref<1x8x32xf32, #tpu.memory_space<vmem>>, %arg6: memref<8x32xf32, #tpu.memory_space<vmem>>) attributes {dimension_semantics = [#tpu.dimension_semantics<parallel>, #tpu.dimension_semantics<arbitrary>], iteration_bounds = array<i64: 1, 2>, scalar_prefetch = 1 : i64, scratch_operands = 1 : i64, tpu.core_type = #tpu.core_type<tc>, window_params = [{pipeline_mode = #tpu.pipeline_mode<synchronous>, transform_indices = @transform_0, window_bounds = array<i64: 16, 32>}, {transform_indices = @transform_1, window_bounds = array<i64: 8, 32>}, {transform_indices = @transform_2, window_bounds = array<i64: 1, 8, 32>}]} {
    %c8_i32 = arith.constant 8 : i32
    %0 = arith.muli %arg1, %c8_i32 : i32
    %c8_i32_0 = arith.constant 8 : i32
    %1 = arith.muli %arg0, %c8_i32_0 : i32
    %2 = arith.addi %0, %1 : i32
    %c0_i32 = arith.constant 0 : i32
    %3 = arith.addi %2, %c0_i32 : i32
    %4 = arith.index_cast %3 : i32 to index
    %5 = memref.load %arg2[%4] : memref<16xi32, #tpu.memory_space<smem>>
    %6 = arith.index_cast %5 : i32 to index
    %c0 = arith.constant 0 : index
    %7 = vector.load %arg3[%6, %c0] : memref<16x32xf32, #tpu.memory_space<vmem>>, vector<1x32xf32>
    %c0_1 = arith.constant 0 : index
    %c0_2 = arith.constant 0 : index
    %8 = vector.load %arg6[%c0_1, %c0_2] : memref<8x32xf32, #tpu.memory_space<vmem>>, vector<1x32xf32>
    tpu.vector_store %arg6[%c0_1, %c0_2], %7 {strides = array<i32>} : memref<8x32xf32, #tpu.memory_space<vmem>>, vector<1x32xf32>,
    %c1_i32 = arith.constant 1 : i32
    %9 = arith.addi %2, %c1_i32 : i32
    %10 = arith.index_cast %9 : i32 to index
    %11 = memref.load %arg2[%10] : memref<16xi32, #tpu.memory_space<smem>>
    %12 = arith.index_cast %11 : i32 to index
    %c0_3 = arith.constant 0 : index
    %13 = vector.load %arg3[%12, %c0_3] : memref<16x32xf32, #tpu.memory_space<vmem>>, vector<1x32xf32>
    %c1 = arith.constant 1 : index
    %c0_4 = arith.constant 0 : index
    %14 = vector.load %arg6[%c1, %c0_4] : memref<8x32xf32, #tpu.memory_space<vmem>>, vector<1x32xf32>
    tpu.vector_store %arg6[%c1, %c0_4], %13 {strides = array<i32>} : memref<8x32xf32, #tpu.memory_space<vmem>>, vector<1x32xf32>,
    %c2_i32 = arith.constant 2 : i32
    %15 = arith.addi %2, %c2_i32 : i32
    %16 = arith.index_cast %15 : i32 to index
    %17 = memref.load %arg2[%16] : memref<16xi32, #tpu.memory_space<smem>>
    %18 = arith.index_cast %17 : i32 to index
    %c0_5 = arith.constant 0 : index
    %19 = vector.load %arg3[%18, %c0_5] : memref<16x32xf32, #tpu.memory_space<vmem>>, vector<1x32xf32>
    %c2 = arith.constant 2 : index
    %c0_6 = arith.constant 0 : index
    %20 = vector.load %arg6[%c2, %c0_6] : memref<8x32xf32, #tpu.memory_space<vmem>>, vector<1x32xf32>
    tpu.vector_store %arg6[%c2, %c0_6], %19 {strides = array<i32>} : memref<8x32xf32, #tpu.memory_space<vmem>>, vector<1x32xf32>,
    %c3_i32 = arith.constant 3 : i32
    %21 = arith.addi %2, %c3_i32 : i32
    %22 = arith.index_cast %21 : i32 to index
    %23 = memref.load %arg2[%22] : memref<16xi32, #tpu.memory_space<smem>>
    %24 = arith.index_cast %23 : i32 to index
    %c0_7 = arith.constant 0 : index
    %25 = vector.load %arg3[%24, %c0_7] : memref<16x32xf32, #tpu.memory_space<vmem>>, vector<1x32xf32>
    %c3 = arith.constant 3 : index
    %c0_8 = arith.constant 0 : index
    %26 = vector.load %arg6[%c3, %c0_8] : memref<8x32xf32, #tpu.memory_space<vmem>>, vector<1x32xf32>
    tpu.vector_store %arg6[%c3, %c0_8], %25 {strides = array<i32>} : memref<8x32xf32, #tpu.memory_space<vmem>>, vector<1x32xf32>,
    %c4_i32 = arith.constant 4 : i32
    %27 = arith.addi %2, %c4_i32 : i32
    %28 = arith.index_cast %27 : i32 to index
    %29 = memref.load %arg2[%28] : memref<16xi32, #tpu.memory_space<smem>>
    %30 = arith.index_cast %29 : i32 to index
    %c0_9 = arith.constant 0 : index
    %31 = vector.load %arg3[%30, %c0_9] : memref<16x32xf32, #tpu.memory_space<vmem>>, vector<1x32xf32>
    %c4 = arith.constant 4 : index
    %c0_10 = arith.constant 0 : index
    %32 = vector.load %arg6[%c4, %c0_10] : memref<8x32xf32, #tpu.memory_space<vmem>>, vector<1x32xf32>
    tpu.vector_store %arg6[%c4, %c0_10], %31 {strides = array<i32>} : memref<8x32xf32, #tpu.memory_space<vmem>>, vector<1x32xf32>,
    %c5_i32 = arith.constant 5 : i32
    %33 = arith.addi %2, %c5_i32 : i32
    %34 = arith.index_cast %33 : i32 to index
    %35 = memref.load %arg2[%34] : memref<16xi32, #tpu.memory_space<smem>>
    %36 = arith.index_cast %35 : i32 to index
    %c0_11 = arith.constant 0 : index
    %37 = vector.load %arg3[%36, %c0_11] : memref<16x32xf32, #tpu.memory_space<vmem>>, vector<1x32xf32>
    %c5 = arith.constant 5 : index
    %c0_12 = arith.constant 0 : index
    %38 = vector.load %arg6[%c5, %c0_12] : memref<8x32xf32, #tpu.memory_space<vmem>>, vector<1x32xf32>
    tpu.vector_store %arg6[%c5, %c0_12], %37 {strides = array<i32>} : memref<8x32xf32, #tpu.memory_space<vmem>>, vector<1x32xf32>,
    %c6_i32 = arith.constant 6 : i32
    %39 = arith.addi %2, %c6_i32 : i32
    %40 = arith.index_cast %39 : i32 to index
    %41 = memref.load %arg2[%40] : memref<16xi32, #tpu.memory_space<smem>>
    %42 = arith.index_cast %41 : i32 to index
    %c0_13 = arith.constant 0 : index
    %43 = vector.load %arg3[%42, %c0_13] : memref<16x32xf32, #tpu.memory_space<vmem>>, vector<1x32xf32>
    %c6 = arith.constant 6 : index
    %c0_14 = arith.constant 0 : index
    %44 = vector.load %arg6[%c6, %c0_14] : memref<8x32xf32, #tpu.memory_space<vmem>>, vector<1x32xf32>
    tpu.vector_store %arg6[%c6, %c0_14], %43 {strides = array<i32>} : memref<8x32xf32, #tpu.memory_space<vmem>>, vector<1x32xf32>,
    %c7_i32 = arith.constant 7 : i32
    %45 = arith.addi %2, %c7_i32 : i32
    %46 = arith.index_cast %45 : i32 to index
    %47 = memref.load %arg2[%46] : memref<16xi32, #tpu.memory_space<smem>>
    %48 = arith.index_cast %47 : i32 to index
    %c0_15 = arith.constant 0 : index
    %49 = vector.load %arg3[%48, %c0_15] : memref<16x32xf32, #tpu.memory_space<vmem>>, vector<1x32xf32>
    %c7 = arith.constant 7 : index
    %c0_16 = arith.constant 0 : index
    %50 = vector.load %arg6[%c7, %c0_16] : memref<8x32xf32, #tpu.memory_space<vmem>>, vector<1x32xf32>
    tpu.vector_store %arg6[%c7, %c0_16], %49 {strides = array<i32>} : memref<8x32xf32, #tpu.memory_space<vmem>>, vector<1x32xf32>,
    %c0_17 = arith.constant 0 : index
    %c0_18 = arith.constant 0 : index
    %51 = vector.load %arg6[%c0_17, %c0_18] : memref<8x32xf32, #tpu.memory_space<vmem>>, vector<8x32xf32>
    %cst = arith.constant 5.65685415 : f32
    %52 = vector.broadcast %cst : f32 to vector<8x32xf32>
    %53 = arith.mulf %51, %52 : vector<8x32xf32>
    %c0_19 = arith.constant 0 : index
    %c0_20 = arith.constant 0 : index
    %54 = vector.load %arg4[%c0_19, %c0_20] : memref<8x32xf32, #tpu.memory_space<vmem>>, vector<8x32xf32>
    %55 = arith.addf %53, %54 : vector<8x32xf32>
    %c0_21 = arith.constant 0 : index
    %c0_22 = arith.constant 0 : index
    %c0_23 = arith.constant 0 : index
    %56 = vector.load %arg5[%c0_21, %c0_22, %c0_23] : memref<1x8x32xf32, #tpu.memory_space<vmem>>, vector<1x8x32xf32>
    %57 = vector.shape_cast %56 : vector<1x8x32xf32> to vector<8x32xf32>
    %58 = vector.shape_cast %55 : vector<8x32xf32> to vector<1x8x32xf32>
    tpu.vector_store %arg5[%c0_21, %c0_22, %c0_23], %58 {strides = array<i32>} : memref<1x8x32xf32, #tpu.memory_space<vmem>>, vector<1x8x32xf32>,
    return
  }
  func.func @transform_0(%arg0: i32, %arg1: i32, %arg2: memref<16xi32, #tpu.memory_space<smem>>) -> (i32, i32) {
    %c0_i32 = arith.constant 0 : i32
    %c0_i32_0 = arith.constant 0 : i32
    %c0_i32_1 = arith.constant 0 : i32
    return %c0_i32, %c0_i32_0 : i32, i32
  }
  func.func @transform_1(%arg0: i32, %arg1: i32, %arg2: memref<16xi32, #tpu.memory_space<smem>>) -> (i32, i32) {
    %c0_i32 = arith.constant 0 : i32
    %c0_i32_0 = arith.constant 0 : i32
    return %arg0, %c0_i32 : i32, i32
  }
  func.func @transform_2(%arg0: i32, %arg1: i32, %arg2: memref<16xi32, #tpu.memory_space<smem>>) -> (i32, i32, i32) {
    %c0_i32 = arith.constant 0 : i32
    %c0_i32_0 = arith.constant 0 : i32
    return %arg1, %arg0, %c0_i32 : i32, i32, i32
  }
}

</mosaic_0001>

<bundles_post_ra>
// kernel: tpu_custom_call.1
= control target key start
LH: loop header
LB: loop body
LE: loop exit
PB: predicated region body
PF: predicated region fallthrough
CT: control target
= control target key end

     0   :  { %s569_s12 = smov [#allocation4]   ;;  %s751_s0 = inlined_call_operand.hbm [shape: s32[16], index: 0, kind: input, shape index: {}]   ;;  %s752_s1 = inlined_call_operand.hbm [shape: f32[16,32], index: 1, kind: input, shape index: {}]   ;;  %s753_s2 = inlined_call_operand.hbm [shape: f32[16,32], index: 2, kind: input, shape index: {}]   ;;  %s754_s3 = inlined_call_operand.hbm [shape: f32[2,8,32], index: 3, kind: output, shape index: {}]  }
   0x1   :  { %9 = dma.hbm_to_smem %s751_s0, 16, %s569_s12, [#allocation3] }
   0x2   :  { %531 = dma.done.wait [#allocation3], 16 }
   0x3   :  { %532 = vsyncadd [#allocation3], 4294967280 }
   0x4   :  { %11 = sfence }
   0x5   :  { %12 = vsyncpa [#allocation6], 0 }
   0x6   :  { %13 = vsyncpa [#allocation9], 0 }
   0x7   :  { %14 = vsyncpa [#allocation7], 0 }
   0x8   :  { %16 = vsyncpa [#allocation7 + $0x1], 0  ;;  %s598_s15 = smov 0   ;;  %s600_s16 = smov 0  }
   0x9   :  { %s602_s17 = smov 0   ;;  %s604_s18 = smov 0  }
   0xa   :  { %s606_s19 = smov 0   ;;  %s608_s20 = smov 0  }
   0xb LB: > { %s328_s0 = sadd.s32 4294967295, %s567_s20   ;;  %s329_s21 = sadd.s32 4294967294, %s567_s20   ;;  %s567_s20 = sphi %s608_s20, %s22_s20   ;;  %s563_s19 = sphi %s606_s19, %s767_s19   ;;  %s559_s18 = sphi %s604_s18, %s766_s18   ;;  %s555_s17 = sphi %s602_s17, %s765_s17   ;;  %s551_s16 = sphi %s600_s16, %s764_s16   ;;  %s547_s15 = sphi %s598_s15, %s763_s15  }
   0xc   : > { %s31_s22 = sadd.s32 1, %s563_s19  ;;  %s90_s23 = sadd.s32 1, %s555_s17 }
   0xd   : > { %p32_p0 = scmp.ge.s32.totalorder %s31_s22, 2  ;;  %p100_p1 = scmp.ne.s32.totalorder %s555_s17, %s551_s16 }
   0xe   : > { %p101_p2 = scmp.eq.s32.totalorder %s328_s0, 1  ;;  %p106_p3 = scmp.ne.s32.totalorder %s551_s16, %s547_s15 }
   0xf   : > { %s769_s22 = smov (%p32_p0, %s31_s22), 0  ;;  %p107_p5 = scmp.eq.s32.totalorder %s329_s21, 1 }
  0x10   : > { %p638_p4 = por %p101_p2, %p100_p1  ;;  %s85_s25 = ssub.s32 %s563_s19, %s769_s22 }
  0x11   : > { %p330_p6 = scmp.ge.s32.totalorder %s567_s20, 1  ;;  %p88_p7 = scmp.eq.s32.totalorder %s85_s25, 0 }
  0x12   : > { %s756_s24 = scalar_select %p638_p4, 1, 0 }
  0x13   : > { %p645_p8 = por %p107_p5, %p106_p3  ;;  %p114_p9 = scmp.lt.s32.totalorder %s567_s20, 3 }
  0x14   : > { %s651_s27 = scalar_select %p88_p7, %s555_s17, %s90_s23  }
  0x15   : > { %s757_s26 = scalar_select %p645_p8, 1, 0 }
  0x16   : > { %p653_p10 = pnand %p330_p6, %p114_p9  ;;  %p657_p11 = scmp.eq.s32.totalorder %s328_s0, 0 }
  0x17   : > { %s570_s30 = smov [#allocation5]   ;;  %s571_s6 = smov [#allocation8]  }
  0x18   : > { %p352_p12 = pneg %p653_p10  ;;  %s126_s4 = sshll.u32 %s570_s30, 4  ;;  %s127_s4 = int_to_ptr.vmem [resolvable:$true] %s126_s4 }
  0x19   : > { %s142_s7 = sshll.u32 %s571_s6, 4  ;;  %s440_s8 = scalar_lea.vmem %s127_s4, 256  ;;  %s143_s7 = int_to_ptr.vmem [resolvable:$true] %s142_s7 }
  0x1a   : > { %p665_p13 = pnand %p657_p11, %p352_p12  ;;  %p441_p1 = scmp.ne.s32.totalorder %s127_s4, %s440_s8 }
  0x1b   : > { %p448_p5 = scmp.lt.s32.totalorder %s127_s4, %s127_s4  ;;  %p449_p6 = scmp.lt.s32.totalorder %s440_s8, %s440_s8 }
  0x1c   : > { %p431_p0 = pneg %p665_p13 }
  0x1d   : > { %p450_p7 = por %p449_p6, %p448_p5 }
  0x1e   : > { %p443_p2 = pnand %p441_p1, %p431_p0 }
  0x20   : > { %p444_p3 = pneg %p443_p2 }
  0x22   : > { %p451_p9 = pnand %p450_p7, %p444_p3 }
  0x24   : > { %454 = shalt.err (!%p451_p9)
}
  0x25   : > { %s572_s9 = smov 128   ;;  %s573_s10 = smov 8  }
  0x26   : > { %355 = dma.hbm_to_vmem [thread:$0]  (!%p665_p13), %s752_s1, 256, %s127_s4, [#allocation6], %s572_s9, %s572_s9, %s573_s10  }
  0x27   : > { %s466_s13 = scalar_lea.vmem %s143_s7, 128  ;;  %p474_p8 = scmp.lt.s32.totalorder %s143_s7, %s143_s7 }
  0x28   : > { %p467_p12 = scmp.ne.s32.totalorder %s143_s7, %s466_s13  ;;  %p475_p4 = scmp.lt.s32.totalorder %s466_s13, %s466_s13 }
  0x2a   : > { %p469_p1 = pnand %p467_p12, %p431_p0  ;;  %p476_p5 = por %p475_p4, %p474_p8 }
  0x2c   : > { %p470_p2 = pneg %p469_p1 }
  0x2e   : > { %p477_p3 = pnand %p476_p5, %p470_p2 }
  0x30   : > { %480 = shalt.err (!%p477_p3)
}
  0x31   : > { %358 = dma.hbm_to_vmem [thread:$0]  (!%p665_p13), %s753_s2, 128, %s143_s7, [#allocation9]  }
  0x32   : > { %155 = sbr.rel (%p653_p10) target bundleno = 100 (0x64), region = 28 }
  0x37   : > { %534 = dma.done.wait (%p657_p11), [#allocation6], 256  }
  0x38   : > { %536 = vsyncadd (%p657_p11), [#allocation6], 4294967040 }
  0x39   : > { %538 = dma.done.wait (%p657_p11), [#allocation9], 128  }
  0x3a   : > { %540 = vsyncadd (%p657_p11), [#allocation9], 4294967168  ;;  %s337_s21 = sshll.u32 %s559_s18, 3  ;;  %vm182_vm0 = vcmask 253952   ;;  %v221_v9 = vld [vmem:[#allocation8] sm:$0xff]  ;;  %vm223_vm1 = vcmask 261120  }
  0x3b   : > { %s179_s23 = sld [smem:[#allocation4 + %s337_s21]]  ;;  %s184_s25 = sadd.s32 1, %s337_s21 }
  0x3c   : > { %s185_s30 = sld [smem:[#allocation4 + %s184_s25]]  ;;  %s189_s4 = sadd.s32 2, %s337_s21 }
  0x3d   : > { %s190_s28 = sld [smem:[#allocation4 + %s189_s4]]  ;;  %s194_s5 = sadd.s32 3, %s337_s21 }
  0x3e   : > { %s195_s6 = sld [smem:[#allocation4 + %s194_s5]]  ;;  %s199_s7 = sadd.s32 4, %s337_s21 }
  0x3f   : > { %s200_s8 = sld [smem:[#allocation4 + %s199_s7]]  ;;  %s204_s9 = sadd.s32 5, %s337_s21 }
  0x40   : > { %s205_s10 = sld [smem:[#allocation4 + %s204_s9]]  ;;  %s209_s11 = sadd.s32 6, %s337_s21 }
  0x41   : > { %s210_s12 = sld [smem:[#allocation4 + %s209_s11]]  ;;  %s180_s13 = scalar_lea.vmem [#allocation5], %s179_s23 }
  0x42   : > { %v181_v0 = vld [vmem:[%s180_s13] sm:$0x1]  ;;  %s214_s29 = sadd.s32 7, %s337_s21  ;;  %s186_s14 = scalar_lea.vmem [#allocation5], %s185_s30 }
  0x43   : > { %183 = vst.msk [vmem:[#allocation2] sm:$0x1] %vm182_vm0, %v181_v0  ;;  %v187_v1 = vld [vmem:[%s186_s14] sm:$0x1]  ;;  %s215_s0 = sld [smem:[#allocation4 + %s214_s29]]  ;;  %s191_s25 = scalar_lea.vmem [#allocation5], %s190_s28 }
  0x44   : > { %188 = vst.msk [vmem:[#allocation2 + $0x1] sm:$0x1] %vm182_vm0, %v187_v1  ;;  %v192_v2 = vld [vmem:[%s191_s25] sm:$0x1]  ;;  %s196_s4 = scalar_lea.vmem [#allocation5], %s195_s6  ;;  %s173_s30 = sand.u32 1, %s551_s16  }
  0x45   : > { %193 = vst.msk [vmem:[#allocation2 + $0x2] sm:$0x1] %vm182_vm0, %v192_v2  ;;  %v197_v3 = vld [vmem:[%s196_s4] sm:$0x1]  ;;  %s201_s5 = scalar_lea.vmem [#allocation5], %s200_s8  ;;  %s336_s6 = sshll.u32 %s173_s30, 3 }
  0x46   : > { %198 = vst.msk [vmem:[#allocation2 + $0x3] sm:$0x1] %vm182_vm0, %v197_v3  ;;  %v202_v4 = vld [vmem:[%s201_s5] sm:$0x1]  ;;  %s206_s21 = scalar_lea.vmem [#allocation5], %s205_s10  ;;  %s175_s7 = scalar_lea.vmem [#allocation10], %s336_s6 }
  0x47   : > { %203 = vst.msk [vmem:[#allocation2 + $0x4] sm:$0x1] %vm182_vm0, %v202_v4  ;;  %v207_v5 = vld [vmem:[%s206_s21] sm:$0x1]  ;;  %s211_s23 = scalar_lea.vmem [#allocation5], %s210_s12  ;;  %s240_s8 = sshll.u32 %s175_s7, 4  ;;  %s708_s8 = int_to_ptr.vmem [resolvable:$true] %s240_s8 }
  0x48   : > { %208 = vst.msk [vmem:[#allocation2 + $0x5] sm:$0x1] %vm182_vm0, %v207_v5  ;;  %v212_v6 = vld [vmem:[%s211_s23] sm:$0x1]  ;;  %s339_s9 = sshll.u32 %s559_s18, 7  ;;  %s226_s13 = scalar_lea.sflag [#allocation7], %s173_s30 }
  0x49   : > { %213 = vst.msk [vmem:[#allocation2 + $0x6] sm:$0x1] %vm182_vm0, %v212_v6  ;;  %s216_s28 = scalar_lea.vmem [#allocation5], %s215_s0  ;;  %s238_s12 = scalar_lea.hbm %s754_s3, %s339_s9 }
  0x4a   : > { %v217_v7 = vld [vmem:[%s216_s28] sm:$0x1]  ;;  %s481_s29 = scalar_lea.vmem %s708_s8, 128  ;;  %p761_p8 = scmp.ne.s32.totalorder %s756_s24, 0 }
  0x4b   : > { %218 = vst.msk [vmem:[#allocation2 + $0x7] sm:$0x1] %vm182_vm0, %v217_v7  ;;  %p482_p4 = scmp.ne.s32.totalorder %s708_s8, %s481_s29  ;;  %s574_s18 = smov [#allocation10]  }
  0x4c   : > { %s485_s14 = sshll.u32 %s574_s18, 4  ;;  %s486_s14 = int_to_ptr.vmem [resolvable:$false] %s485_s14 }
  0x4d   : > { %p483_p10 = pnand %p482_p4, %p761_p8  ;;  %s487_s0 = scalar_lea.vmem %s486_s14, 256 }
  0x4e   : > { %p488_p13 = scmp.lt.s32.totalorder %s708_s8, %s486_s14  ;;  %p489_p0 = scmp.lt.s32.totalorder %s487_s0, %s481_s29 }
  0x4f   : > { %p484_p11 = pneg %p483_p10 }
  0x50   : > { %p490_p6 = por %p489_p0, %p488_p13 }
  0x52   : > { %v219_v8 = vld [vmem:[#allocation2] sm:$0xff]  ;;  %p491_p7 = pnand %p490_p6, %p484_p11 }
  0x53   : > { %v220_v10 = vmul.f32 5.656854, %v219_v8 }
  0x55   : > { %v222_v11 = vadd.f32 %v221_v9, %v220_v10 }
  0x57   : > { %224 = vst.msk [vmem:[%s175_s7] sm:$0xff] %vm223_vm1, %v222_v11 }
  0x58   : > { %494 = shalt.err (!%p491_p7)
}
  0x59   : > { %s495_s25 = scalar_lea.hbm %s238_s12, 128  ;;  %s499_s21 = scalar_lea.hbm %s754_s3, 256 }
  0x5a   : > { %p496_p9 = scmp.ne.s32.totalorder %s238_s12, %s495_s25  ;;  %p500_p2 = scmp.lt.s32.totalorder %s238_s12, %s754_s3 }
  0x5b   : > { %p501_p5 = scmp.lt.s32.totalorder %s499_s21, %s495_s25 }
  0x5c   : > { %p497_p12 = pnand %p496_p9, %p761_p8 }
  0x5d   : > { %p502_p3 = por %p501_p5, %p500_p2 }
  0x5e   : > { %p498_p1 = pneg %p497_p12 }
  0x60   : > { %p503_p4 = pnand %p502_p3, %p498_p1 }
  0x62   : > { %506 = shalt.err (!%p503_p4)
}
  0x63   : > { %350 = dma.vmem_to_hbm [thread:$0]  (%p761_p8), %s708_s8, 128, %s238_s12, %s226_s13  }
  0x64 PF: > { %p367_p10 = scmp.ge.s32.totalorder %s567_s20, 2  ;;  %s252_s28 = sand.u32 1, %s547_s15  }
  0x65   : > { %p762_p11 = scmp.ne.s32.totalorder %s757_s26, 0  ;;  %s253_s6 = scalar_lea.sflag [#allocation7], %s252_s28 }
  0x67   : > { %p360_p13 = pnand %p367_p10, %p762_p11 }
  0x69   : > { %p361_p0 = pneg %p360_p13 }
  0x6b   : > { %542 = dma.done.wait (%p361_p0), %s253_s6, 128  }
  0x6c   : > { %544 = vsyncadd (%p361_p0), %s253_s6, 4294967168  ;;  %s22_s20 = sadd.s32 1, %s567_s20   ;;  %s763_s15 = smov %s551_s16 }
  0x6d   : > { %p19_p6 = scmp.ge.s32.totalorder %s22_s20, 4   ;;  %s764_s16 = smov %s555_s17 }
  0x6e   : > { %s765_s17 = smov %s651_s27  ;;  %s766_s18 = smov %s563_s19 }
  0x6f   : > { %s767_s19 = smov %s769_s22  ;;  %21 = sbr.rel (!%p19_p6) target bundleno = 11 (0xb), region = 78 }
  0x74   :  { %258 = vsyncpa [#allocation6], 1 }
  0x75   :  { %260 = vsyncpa [#allocation6 + $0x1], 1 }
  0x76   :  { %261 = vsyncpa [#allocation9], 1 }
  0x77   :  { %262 = vsyncpa [#allocation7], 1 }
  0x78   :  { %264 = vsyncpa [#allocation7 + $0x1], 1 }

</bundles_post_ra>
